<compile_context>
chip_gen: v6e
topology: v6e:2x2x1
jax: 0.10.0
libtpu: 0.0.40
codegen_flags: <defaults>
</compile_context>

<pallas_src>
import functools

import jax
import jax.numpy as jnp
from jax import lax
from jax.experimental import pallas as pl
from jax.experimental.pallas import tpu as pltpu

_PI = jnp.float32(3.14159)   # match the PyTorch source literal exactly (do NOT use jnp.pi)
_LANES = 128
_MAX_TILE_ROWS = 512         # 512 x 128 f32 = 256 KiB per buffer


def _temp_diff(t):
    return 100.0 * 2.0 * _PI * jnp.cos(2.0 * _PI * t / 365.0) / 365.0


def _round_up(x, m):
    return ((x + m - 1) // m) * m


def _lane_dense_pack(state):
    """Flatten (B, D) row-major and pad/reshape to (rows_padded, 128) lane-dense."""
    b, d = state.shape
    n = b * d
    rows = -(-n // _LANES)                               # ceil
    tile_rows = min(_MAX_TILE_ROWS, _round_up(max(rows, 1), 8))
    rows_p = _round_up(rows, tile_rows)
    n_p = rows_p * _LANES
    flat = jnp.pad(state.reshape(-1), (0, n_p - n))
    return flat.reshape(rows_p, _LANES), tile_rows, rows_p, n


def _lane_mask(shape, d, tile_rows):
    """Mask selecting the flattened positions that correspond to state[..., 0]."""
    lane = lax.broadcasted_iota(jnp.int32, shape, 1)
    if _LANES % d == 0:
        return (lane % d) == 0
    # General D (does not divide 128): mask from the global flat index.
    row = lax.broadcasted_iota(jnp.int32, shape, 0)
    base = pl.program_id(0) * (tile_rows * _LANES)
    return ((base + row * _LANES + lane) % d) == 0


# --------------------- single derivative evaluation (forward) --------------------- #

def _ricker_fwd_kernel(scal_ref, x_ref, o_ref, *, d, tile_rows):
    # scal_ref (SMEM f32[2]):  c0 = alpha*(1 + bx*td + cx*td^2),  c1 = alpha*beta
    c0 = scal_ref[0]
    c1 = scal_ref[1]
    s = x_ref[...]                                       # (tile_rows, 128) f32
    g = s * jnp.exp(c0 - c1 * s)                         # full-tile; masked lanes discarded
    mask = _lane_mask(s.shape, d, tile_rows)
    o_ref[...] = jnp.where(mask, g, jnp.float32(0.0))


def ricker_ode_forward(t, state, params):
    """t: scalar, state: (B, D) f32, params: (5,) f32 [alpha, beta, bx, cx, timesteps]."""
    state = state.astype(jnp.float32)
    params = params.astype(jnp.float32)
    t = jnp.asarray(t, jnp.float32)
    b, d = state.shape

    alpha, beta, bx, cx = params[0], params[1], params[2], params[3]
    td = _temp_diff(t)                                   # O(1) scalar hoist
    c0 = alpha * (1.0 + bx * td + cx * td * td)
    c1 = alpha * beta
    scal = jnp.stack([c0, c1]).astype(jnp.float32)       # (2,) -> SMEM (scalar prefetch)

    packed, tile_rows, rows_p, n = _lane_dense_pack(state)
    n_p = rows_p * _LANES
    grid = (rows_p // tile_rows,)

    out = pl.pallas_call(
        functools.partial(_ricker_fwd_kernel, d=d, tile_rows=tile_rows),
        out_shape=jax.ShapeDtypeStruct((rows_p, _LANES), jnp.float32),
        grid_spec=pltpu.PrefetchScalarGridSpec(
            num_scalar_prefetch=1,
            grid=grid,
            in_specs=[pl.BlockSpec((tile_rows, _LANES), lambda i, scal_ref: (i, 0))],
            out_specs=pl.BlockSpec((tile_rows, _LANES), lambda i, scal_ref: (i, 0)),
        ),
        compiler_params=pltpu.CompilerParams(
            dimension_semantics=("parallel",),            # v7x megacore sharding
        ),
        cost_estimate=pl.CostEstimate(
            flops=6 * n_p, transcendentals=n_p, bytes_accessed=2 * n_p * 4),
    )(scal, packed)

    return out.reshape(-1)[:n].reshape(b, d)


# ------------------ fused Euler time loop (one launch, all steps) ------------------ #

def _ricker_euler_kernel(scal_ref, x_ref, o_ref, *, num_steps, d, tile_rows):
    # scal_ref (SMEM f32[num_steps + 2]): [c1, dt, c0[0], c0[1], ..., c0[num_steps-1]]
    c1 = scal_ref[0]
    dt = scal_ref[1]
    mask = _lane_mask(x_ref.shape, d, tile_rows)          # hoisted out of the loop

    def step(k, s):
        c0 = scal_ref[2 + k]                              # precomputed per-step constant
        g = s * jnp.exp(c0 - c1 * s)
        return s + dt * jnp.where(mask, g, jnp.float32(0.0))

    o_ref[...] = lax.fori_loop(0, num_steps, step, x_ref[...], unroll=2)


def ricker_ode_integrate_euler(t0, dt, num_steps, state, params):
    """Explicit-Euler integration of the Ricker ODE fused into one pallas_call."""
    state = state.astype(jnp.float32)
    params = params.astype(jnp.float32)
    num_steps = int(num_steps)
    b, d = state.shape

    alpha, beta, bx, cx = params[0], params[1], params[2], params[3]
    t0 = jnp.asarray(t0, jnp.float32)
    dt = jnp.asarray(dt, jnp.float32)
    ks = jnp.arange(num_steps, dtype=jnp.float32)
    td = _temp_diff(t0 + ks * dt)                         # (num_steps,)
    c0_tbl = alpha * (1.0 + bx * td + cx * td * td)       # per-step exponent constants
    c1 = alpha * beta
    scal = jnp.concatenate(
        [jnp.stack([c1, dt]), c0_tbl]).astype(jnp.float32)  # (num_steps + 2,) -> SMEM

    packed, tile_rows, rows_p, n = _lane_dense_pack(state)
    grid = (rows_p // tile_rows,)

    out = pl.pallas_call(
        functools.partial(_ricker_euler_kernel,
                          num_steps=num_steps, d=d, tile_rows=tile_rows),
        out_shape=jax.ShapeDtypeStruct((rows_p, _LANES), jnp.float32),
        grid_spec=pltpu.PrefetchScalarGridSpec(
            num_scalar_prefetch=1,
            grid=grid,
            in_specs=[pl.BlockSpec((tile_rows, _LANES), lambda i, scal_ref: (i, 0))],
            out_specs=pl.BlockSpec((tile_rows, _LANES), lambda i, scal_ref: (i, 0)),
        ),
        compiler_params=pltpu.CompilerParams(
            dimension_semantics=("parallel",),
        ),
    )(scal, packed)

    return out.reshape(-1)[:n].reshape(b, d)


# ---------------------------------- references ------------------------------------ #

def ricker_ode_reference(t, state, params):
    alpha, beta, bx, cx = params[0], params[1], params[2], params[3]
    td = _temp_diff(jnp.asarray(t, jnp.float32))
    x = state[..., 0]
    sol = jnp.zeros_like(state)
    return sol.at[..., 0].set(
        x * jnp.exp(alpha * (1.0 - beta * x + bx * td + cx * td * td)))


def euler_reference(t0, dt, num_steps, state, params):
    s = state
    for k in range(num_steps):
        s = s + dt * ricker_ode_reference(t0 + k * dt, s, params)
    return s


if __name__ == "__main__":
    key = jax.random.PRNGKey(0)

    # Parameters matching Ricker_ODE.__init__ defaults: alpha, beta, bx, cx, timesteps.
    params = jnp.array([0.5, 1.0, 0.8, 0.9, 150.0], dtype=jnp.float32)

    B, D = 8, 4
    state = jax.random.uniform(key, (B, D), dtype=jnp.float32, minval=0.1, maxval=2.0)
    t = jnp.float32(37.0)

    # 1) Single forward (derivative) evaluation — the module's forward().
    out = jax.block_until_ready(ricker_ode_forward(t, state, params))
    ref = ricker_ode_reference(t, state, params)
    assert out.shape == state.shape and out.dtype == jnp.float32
    assert jnp.allclose(out, ref, rtol=1e-5, atol=1e-5), (out, ref)

    # 2) Fused Euler time loop — many forward() evaluations in one pallas_call.
    t0, dt, n_steps = 37.0, 0.02, 24
    out_int = jax.block_until_ready(
        ricker_ode_integrate_euler(t0, dt, n_steps, state, params))
    ref_int = euler_reference(t0, dt, n_steps, state, params)
    assert out_int.shape == state.shape
    assert jnp.allclose(out_int, ref_int, rtol=1e-3, atol=1e-3), (out_int, ref_int)

    print("KERNEL_OK")
</pallas_src>

<mosaic_0001>
module attributes {stable_mosaic.version = 11 : i64} {
  func.func @_ricker_fwd_kernel(%arg0: i32, %arg1: memref<2xf32, #tpu.memory_space<smem>>, %arg2: memref<8x128xf32, #tpu.memory_space<vmem>>, %arg3: memref<8x128xf32, #tpu.memory_space<vmem>>) attributes {dimension_semantics = [#tpu.dimension_semantics<parallel>], iteration_bounds = array<i64: 1>, scalar_prefetch = 1 : i64, scratch_operands = 0 : i64, tpu.core_type = #tpu.core_type<tc>, window_params = [{transform_indices = @transform_0, window_bounds = array<i64: 8, 128>}, {transform_indices = @transform_1, window_bounds = array<i64: 8, 128>}]} {
    %c0 = arith.constant 0 : index
    %0 = memref.load %arg1[%c0] : memref<2xf32, #tpu.memory_space<smem>>
    %c1 = arith.constant 1 : index
    %1 = memref.load %arg1[%c1] : memref<2xf32, #tpu.memory_space<smem>>
    %c0_0 = arith.constant 0 : index
    %c0_1 = arith.constant 0 : index
    %2 = vector.load %arg2[%c0_0, %c0_1] : memref<8x128xf32, #tpu.memory_space<vmem>>, vector<8x128xf32>
    %3 = vector.broadcast %1 : f32 to vector<8x128xf32>
    %4 = arith.mulf %3, %2 : vector<8x128xf32>
    %5 = vector.broadcast %0 : f32 to vector<8x128xf32>
    %6 = arith.subf %5, %4 : vector<8x128xf32>
    %7 = math.exp %6 : vector<8x128xf32>
    %8 = arith.mulf %2, %7 : vector<8x128xf32>
    %9 = tpu.iota {dimensions = array<i32: 1>} : vector<8x128xi32>
    %c4_i32 = arith.constant 4 : i32
    %c0_i32 = arith.constant 0 : i32
    %10 = arith.cmpi eq, %c4_i32, %c0_i32 : i32
    %c1_i32 = arith.constant 1 : i32
    %11 = arith.select %10, %c1_i32, %c4_i32 : i32
    %12 = vector.broadcast %11 : i32 to vector<8x128xi32>
    %13 = arith.remsi %9, %12 : vector<8x128xi32>
    %c0_i32_2 = arith.constant 0 : i32
    %14 = vector.broadcast %c0_i32_2 : i32 to vector<8x128xi32>
    %15 = arith.cmpi ne, %13, %14 : vector<8x128xi32>
    %c0_i32_3 = arith.constant 0 : i32
    %16 = vector.broadcast %c0_i32_3 : i32 to vector<8x128xi32>
    %17 = arith.cmpi slt, %13, %16 : vector<8x128xi32>
    %c0_i32_4 = arith.constant 0 : i32
    %18 = arith.cmpi slt, %11, %c0_i32_4 : i32
    %19 = vector.broadcast %18 : i1 to vector<8x128xi1>
    %20 = vector.broadcast %19 : vector<8x128xi1> to vector<8x128xi1>
    %21 = arith.xori %17, %20 : vector<8x128xi1>
    %22 = arith.andi %21, %15 : vector<8x128xi1>
    %23 = vector.broadcast %11 : i32 to vector<8x128xi32>
    %24 = arith.addi %13, %23 : vector<8x128xi32>
    %25 = arith.select %22, %24, %13 : vector<8x128xi1>, vector<8x128xi32>
    %c0_i32_5 = arith.constant 0 : i32
    %26 = vector.broadcast %c0_i32_5 : i32 to vector<8x128xi32>
    %27 = arith.cmpi eq, %25, %26 : vector<8x128xi32>
    %cst = arith.constant 0.000000e+00 : f32
    %28 = vector.broadcast %cst : f32 to vector<8x128xf32>
    %29 = arith.select %27, %8, %28 : vector<8x128xi1>, vector<8x128xf32>
    %c0_6 = arith.constant 0 : index
    %c0_7 = arith.constant 0 : index
    %30 = vector.load %arg3[%c0_6, %c0_7] : memref<8x128xf32, #tpu.memory_space<vmem>>, vector<8x128xf32>
    tpu.vector_store %arg3[%c0_6, %c0_7], %29 {strides = array<i32>} : memref<8x128xf32, #tpu.memory_space<vmem>>, vector<8x128xf32>,
    return
  }
  func.func @transform_0(%arg0: i32, %arg1: memref<2xf32, #tpu.memory_space<smem>>) -> (i32, i32) {
    %c0_i32 = arith.constant 0 : i32
    %c0_i32_0 = arith.constant 0 : i32
    return %arg0, %c0_i32 : i32, i32
  }
  func.func @transform_1(%arg0: i32, %arg1: memref<2xf32, #tpu.memory_space<smem>>) -> (i32, i32) {
    %c0_i32 = arith.constant 0 : i32
    %c0_i32_0 = arith.constant 0 : i32
    return %arg0, %c0_i32 : i32, i32
  }
}

</mosaic_0001>

<bundles_post_ra>
// kernel: tpu_custom_call.1
= control target key start
LH: loop header
LB: loop body
LE: loop exit
PB: predicated region body
PF: predicated region fallthrough
CT: control target
= control target key end

     0   :  { %s128_s9 = smov [#allocation3]   ;;  %s155_s0 = inlined_call_operand.hbm [shape: f32[2], index: 0, kind: input, shape index: {}]   ;;  %s156_s1 = inlined_call_operand.hbm [shape: f32[8,128], index: 1, kind: input, shape index: {}]   ;;  %s157_s2 = inlined_call_operand.hbm [shape: f32[8,128], index: 2, kind: output, shape index: {}]  }
   0x1   :  { %8 = dma.hbm_to_smem %s155_s0, 16, %s128_s9, [#allocation2] }
   0x2   :  { %122 = dma.done.wait [#allocation2], 16 }
   0x3   :  { %123 = vsyncadd [#allocation2], 4294967280 }
   0x4   :  { %10 = sfence }
   0x5   :  { %11 = vsyncpa [#allocation5], 0 }
   0x6   :  { %12 = vsyncpa [#allocation6], 0  ;;  %s129_s12 = smov [#allocation4]  }
   0x7   :  { %s19_s13 = sshll.u32 %s129_s12, 4  ;;  %s20_s13 = int_to_ptr.vmem [resolvable:$true] %s19_s13 }
   0x8   :  { %s90_s14 = scalar_lea.vmem %s20_s13, 128  ;;  %p95_p1 = scmp.lt.s32.totalorder %s20_s13, %s20_s13 }
   0x9   :  { %p91_p0 = scmp.ne.s32.totalorder %s20_s13, %s90_s14  ;;  %p96_p2 = scmp.lt.s32.totalorder %s90_s14, %s90_s14 }
   0xb   :  { %p97_p3 = por %p96_p2, %p95_p1 }
   0xd   :  { %p98_p4 = pnand %p97_p3, %p91_p0 }
   0xf   :  { %101 = shalt.err (!%p98_p4)
}
  0x10   :  { %22 = dma.hbm_to_vmem [thread:$0]  %s156_s1, 128, %s20_s13, [#allocation5]  }
  0x11   :  { %124 = dma.done.wait [#allocation5], 128  }
  0x12   :  { %125 = vsyncadd [#allocation5], 4294967168  ;;  %s26_s0 = sld [smem:[#allocation3]]  ;;  %v28_v0 = vld [vmem:[#allocation4] sm:$0xff]  ;;  %v36_v6 = vlaneseq  ;;  %s130_s18 = smov [#allocation7]  }
  0x13   :  { %s68_s17 = sld [smem:[#allocation3 + $0x1]]  ;;  %s59_s19 = sshll.u32 %s130_s18, 4  ;;  %s60_s19 = int_to_ptr.vmem [resolvable:$true] %s59_s19 }
  0x14   :  { %v37_v7 = vand.u32 127, %v36_v6  ;;  %s102_s1 = scalar_lea.vmem %s60_s19, 128  ;;  %p107_p6 = scmp.lt.s32.totalorder %s60_s19, %s60_s19 }
  0x15   :  { %p103_p5 = scmp.ne.s32.totalorder %s60_s19, %s102_s1  ;;  %p108_p7 = scmp.lt.s32.totalorder %s102_s1, %s102_s1 }
  0x16   :  { %v42_v8 = vand.u32 3, %v37_v7 }
  0x17   :  { %p109_p8 = por %p108_p7, %p107_p6 }
  0x18   :  { %v31_v1 = vstv %s26_s0  ;;  %vm50_vm0 = vcmp.eq.s32.totalorder %v42_v8, 0 }
  0x19   :  { %v29_v2 = vstv %s68_s17  ;;  %p110_p9 = pnand %p109_p8, %p103_p5 }
  0x1a   :  { %v30_v3 = vmul.f32 %v29_v2, %v28_v0 }
  0x1c   :  { %v32_v4 = vsub.f32 %v31_v1, %v30_v3 }
  0x1e   :  { %v33_v5 = vmul.f32 1.442695, %v32_v4 }
  0x20   :  { %72 = vpow2.f32 %v33_v5 }
  0x2d   :  { %v73_v9 = vpop.eup %72 }
  0x2e   :  { %v35_v10 = vmul.f32 %v73_v9, %v28_v0 }
  0x30   :  { %v51_v11 = vsel %vm50_vm0, %v35_v10, 0.0 }
  0x31   :  { %52 = vst [vmem:[#allocation7] sm:$0xff] %v51_v11 }
  0x32   :  { %113 = shalt.err (!%p110_p9)
}
  0x33   :  { %62 = dma.vmem_to_hbm [thread:$0]  %s60_s19, 128, %s157_s2, [#allocation6]  }
  0x34   :  { %126 = dma.done.wait [#allocation6], 128  }
  0x35   :  { %127 = vsyncadd [#allocation6], 4294967168 }
  0x36   :  { %66 = vsyncpa [#allocation5], 1 }
  0x37   :  { %67 = vsyncpa [#allocation6], 1 }

</bundles_post_ra>
